<compile_context>
chip_gen: v5e
topology: v5e:2x2
jax: 0.10.0
libtpu: 0.0.40
codegen_flags: <defaults>
</compile_context>

<pallas_src>
import functools

import jax
import jax.numpy as jnp
from jax.experimental import pallas as pl
from jax.experimental.pallas import tpu as pltpu


def _pooler_kernel(x_ref, srct_ref, out_ref,
                   sum_acc, sumsq_acc, end_acc, max_acc, min_acc, cnt_acc,
                   *, end_token, pad_token, seq_len, tile_l):
    l = pl.program_id(1)
    n_l = pl.num_programs(1)

    x = x_ref[...].astype(jnp.float32)          # (TL, TB, D)  f32 accumulate path
    src = srct_ref[...]                         # (TL, TB, 1)  int32 (pre-transposed)

    nonpad = src != pad_token                   # (TL, TB, 1), broadcasts over D
    endm = src == end_token

    # Tail masking: only needed when the L tile doesn't divide L (trace-time
    # decision, zero cost in the common divisible case).  Out-of-bounds rows of
    # the last tile contain undefined data; jnp.where (a select) keeps any
    # garbage NaN/Inf from leaking into the reductions.
    if seq_len % tile_l != 0:
        pos = jax.lax.broadcasted_iota(jnp.int32, src.shape, 0) + l * tile_l
        inb = pos < seq_len
        nonpad = jnp.logical_and(nonpad, inb)
        endm = jnp.logical_and(endm, inb)

    @pl.when(l == 0)
    def _init():
        # Global position 0 lives in L-tile 0; write `begin` straight into the
        # resident output block (index_map is constant over l).
        out_ref[0] = x[0].astype(out_ref.dtype)
        sum_acc[...] = jnp.zeros(sum_acc.shape, sum_acc.dtype)
        sumsq_acc[...] = jnp.zeros(sumsq_acc.shape, sumsq_acc.dtype)
        end_acc[...] = jnp.zeros(end_acc.shape, end_acc.dtype)
        max_acc[...] = jnp.full(max_acc.shape, -jnp.inf, max_acc.dtype)
        min_acc[...] = jnp.full(min_acc.shape, jnp.inf, min_acc.dtype)
        cnt_acc[...] = jnp.zeros(cnt_acc.shape, cnt_acc.dtype)

    # Masked running reductions over this L tile (reduction over the leading
    # axis -> cheap elementwise VPU work that hides under the x DMA).
    xm = jnp.where(nonpad, x, 0.0)
    sum_acc[...] += jnp.sum(xm, axis=0)
    sumsq_acc[...] += jnp.sum(xm * xm, axis=0)
    end_acc[...] += jnp.sum(jnp.where(endm, x, 0.0), axis=0)
    max_acc[...] = jnp.maximum(
        max_acc[...], jnp.max(jnp.where(nonpad, x, -jnp.inf), axis=0))
    min_acc[...] = jnp.minimum(
        min_acc[...], jnp.min(jnp.where(nonpad, x, jnp.inf), axis=0))
    cnt_acc[...] += jnp.sum(nonpad.astype(jnp.float32), axis=0)

    @pl.when(l == n_l - 1)
    def _finalize():
        inv = 1.0 / jnp.maximum(cnt_acc[...], 1.0)     # (TB, 1)
        mean = sum_acc[...] * inv
        var = jnp.maximum(sumsq_acc[...] * inv - mean * mean, 0.0)
        std = jnp.sqrt(var)
        od = out_ref.dtype
        out_ref[1] = mean.astype(od)
        out_ref[2] = end_acc[...].astype(od)
        out_ref[3] = max_acc[...].astype(od)
        out_ref[4] = min_acc[...].astype(od)
        out_ref[5] = std.astype(od)


def make_pooler(end_token: int, pad_token: int, *, l_tile_budget_bytes: int = 12 << 20):
    """Returns (x:[L,B,D], src:[B,L]) -> [B, 6*D] fused pooled statistics."""

    def pooler(x, src):
        L, B, D = x.shape
        assert src.shape == (B, L)
        out_dtype = x.dtype

        # Batch tile: whole batch if small / ragged, otherwise sublane-aligned
        # tiles so the "parallel" B grid axis can shard across TensorCores.
        if B > 8 and B % 8 == 0:
            TB = 8
        else:
            TB = B

        # L tile sized so the double-buffered x tile stays within the VMEM
        # budget (budget covers both buffers).
        itemsize = jnp.dtype(x.dtype).itemsize
        tl = l_tile_budget_bytes // max(1, 2 * TB * D * itemsize)
        TL = int(min(L, max(8, tl)))
        TL = max(TL, 1)

        grid = (B // TB, pl.cdiv(L, TL))

        # Wrapper-side layout plumbing (tiny XLA ops, hoisted out of the
        # kernel): pre-transpose src to (L, B, 1) int32.  x is consumed
        # directly in its natural (L, B, D) layout with NO padding copies.
        src_t = jnp.transpose(src.astype(jnp.int32))[:, :, None]   # (L, B, 1)

        kernel = functools.partial(
            _pooler_kernel, end_token=end_token, pad_token=pad_token,
            seq_len=L, tile_l=TL)

        out_p = pl.pallas_call(
            kernel,
            out_shape=jax.ShapeDtypeStruct((6, B, D), out_dtype),
            grid_spec=pltpu.PrefetchScalarGridSpec(
                num_scalar_prefetch=0,
                grid=grid,
                in_specs=[
                    pl.BlockSpec((TL, TB, D), lambda b, l: (l, b, 0)),
                    pl.BlockSpec((TL, TB, 1), lambda b, l: (l, b, 0)),
                ],
                out_specs=pl.BlockSpec((6, TB, D), lambda b, l: (0, b, 0)),
                scratch_shapes=[pltpu.VMEM((TB, D), jnp.float32)
                                for _ in range(5)]
                               + [pltpu.VMEM((TB, 1), jnp.float32)],
            ),
            compiler_params=pltpu.CompilerParams(
                dimension_semantics=("parallel", "arbitrary"),
                vmem_limit_bytes=32 * 1024 * 1024,
            ),
        )(x, src_t)

        # (6, B, D) -> (B, 6*D); order matches torch.cat([begin, mean, end,
        # max, min, std], dim=1).
        return jnp.transpose(out_p, (1, 0, 2)).reshape(B, 6 * D)

    return pooler


def pooler_reference(x, src, end_token, pad_token):
    """Pure-JAX reference (masked population std; see NOTE at top of file)."""
    srct = src.T                                            # (L, B)
    begin = x[0]
    endm = (srct == end_token).astype(x.dtype)[:, :, None]
    end = (x * endm).sum(axis=0)
    padb = srct != pad_token                                # (L, B) bool
    padm = padb.astype(x.dtype)[:, :, None]                 # (L, B, 1)
    counts = jnp.maximum(padm.sum(axis=0), 1.0)             # (B, 1)
    mean = (x * padm).sum(axis=0) / counts
    xmax = jnp.where(padb[:, :, None], x, -jnp.inf).max(axis=0)
    xmin = jnp.where(padb[:, :, None], x, jnp.inf).min(axis=0)
    var = (((x - mean[None]) ** 2) * padm).sum(axis=0) / counts
    std = jnp.sqrt(var)
    # TODO(synk): original module also mutates the caller's x in place (pad
    # positions set to +/-inf) and its torch.std is NaN for padded sequences;
    # neither side-effect is reproduced here.
    return jnp.concatenate([begin, mean, end, xmax, xmin, std], axis=1)


if __name__ == "__main__":
    PAD_TOKEN = 0
    END_TOKEN = 1

    max_len, batch_size, d_model = 8, 2, 32

    key = jax.random.PRNGKey(0)
    kx, ks = jax.random.split(key)

    x = jax.random.normal(kx, (max_len, batch_size, d_model), dtype=jnp.float32)

    # Build src (batch, max_len): content tokens in [2, 10), one END token at
    # position length-1, PAD after that.  Position 0 is never PAD.
    src = jax.random.randint(ks, (batch_size, max_len), 2, 10, dtype=jnp.int32)
    lengths = jnp.array([6, 4], dtype=jnp.int32)
    pos = jnp.arange(max_len)[None, :]
    src = jnp.where(pos == (lengths[:, None] - 1), END_TOKEN, src)
    src = jnp.where(pos >= lengths[:, None], PAD_TOKEN, src).astype(jnp.int32)

    pooler = make_pooler(END_TOKEN, PAD_TOKEN)
    out = pooler(x, src)
    out = jax.block_until_ready(out)

    ref = pooler_reference(x, src, END_TOKEN, PAD_TOKEN)
    assert out.shape == (batch_size, 6 * d_model), out.shape
    assert bool(jnp.all(jnp.isfinite(out)))
    assert jnp.allclose(out, ref, atol=1e-4, rtol=1e-4), (
        float(jnp.max(jnp.abs(out - ref))))

    print("KERNEL_OK")
</pallas_src>

<mosaic_0001>
module attributes {stable_mosaic.version = 11 : i64} {
  func.func @_pooler_kernel(%arg0: i32, %arg1: i32, %arg2: memref<8x2x32xf32, #tpu.memory_space<vmem>>, %arg3: memref<8x2x1xi32, #tpu.memory_space<vmem>>, %arg4: memref<6x2x32xf32, #tpu.memory_space<vmem>>, %arg5: memref<2x32xf32, #tpu.memory_space<vmem>>, %arg6: memref<2x32xf32, #tpu.memory_space<vmem>>, %arg7: memref<2x32xf32, #tpu.memory_space<vmem>>, %arg8: memref<2x32xf32, #tpu.memory_space<vmem>>, %arg9: memref<2x32xf32, #tpu.memory_space<vmem>>, %arg10: memref<2x1xf32, #tpu.memory_space<vmem>>) attributes {dimension_semantics = [#tpu.dimension_semantics<parallel>, #tpu.dimension_semantics<arbitrary>], iteration_bounds = array<i64: 1, 1>, scalar_prefetch = 0 : i64, scratch_operands = 6 : i64, tpu.core_type = #tpu.core_type<tc>, window_params = [{transform_indices = @transform_0, window_bounds = array<i64: 8, 2, 32>}, {transform_indices = @transform_1, window_bounds = array<i64: 8, 2, 1>}, {transform_indices = @transform_2, window_bounds = array<i64: 6, 2, 32>}]} {
    %c0 = arith.constant 0 : index
    %c0_0 = arith.constant 0 : index
    %c0_1 = arith.constant 0 : index
    %0 = vector.load %arg2[%c0, %c0_0, %c0_1] : memref<8x2x32xf32, #tpu.memory_space<vmem>>, vector<8x2x32xf32>
    %c0_2 = arith.constant 0 : index
    %c0_3 = arith.constant 0 : index
    %c0_4 = arith.constant 0 : index
    %1 = vector.load %arg3[%c0_2, %c0_3, %c0_4] : memref<8x2x1xi32, #tpu.memory_space<vmem>>, vector<8x2x1xi32>
    %c0_i32 = arith.constant 0 : i32
    %2 = vector.broadcast %c0_i32 : i32 to vector<8x2x1xi32>
    %3 = arith.cmpi ne, %1, %2 : vector<8x2x1xi32>
    %c1_i32 = arith.constant 1 : i32
    %4 = vector.broadcast %c1_i32 : i32 to vector<8x2x1xi32>
    %5 = arith.cmpi eq, %1, %4 : vector<8x2x1xi32>
    %c0_i32_5 = arith.constant 0 : i32
    %6 = arith.cmpi eq, %arg1, %c0_i32_5 : i32
    %7 = arith.extui %6 : i1 to i32
    %c0_i32_6 = arith.constant 0 : i32
    %8 = arith.cmpi ne, %7, %c0_i32_6 : i32
    scf.if %8 {
      %55 = vector.extract_strided_slice %0 {offsets = [0, 0, 0], sizes = [1, 2, 32], strides = [1, 1, 1]} : vector<8x2x32xf32> to vector<1x2x32xf32>
      %56 = vector.shape_cast %55 : vector<1x2x32xf32> to vector<2x32xf32>
      %c0_42 = arith.constant 0 : index
      %c0_43 = arith.constant 0 : index
      %c0_44 = arith.constant 0 : index
      %57 = vector.load %arg4[%c0_42, %c0_43, %c0_44] : memref<6x2x32xf32, #tpu.memory_space<vmem>>, vector<1x2x32xf32>
      %58 = vector.shape_cast %57 : vector<1x2x32xf32> to vector<2x32xf32>
      %59 = vector.shape_cast %56 : vector<2x32xf32> to vector<1x2x32xf32>
      tpu.vector_store %arg4[%c0_42, %c0_43, %c0_44], %59 {strides = array<i32>} : memref<6x2x32xf32, #tpu.memory_space<vmem>>, vector<1x2x32xf32>,
      %cst_45 = arith.constant 0.000000e+00 : f32
      %60 = vector.broadcast %cst_45 : f32 to vector<2x32xf32>
      %c0_46 = arith.constant 0 : index
      %c0_47 = arith.constant 0 : index
      %61 = vector.load %arg5[%c0_46, %c0_47] : memref<2x32xf32, #tpu.memory_space<vmem>>, vector<2x32xf32>
      tpu.vector_store %arg5[%c0_46, %c0_47], %60 {strides = array<i32>} : memref<2x32xf32, #tpu.memory_space<vmem>>, vector<2x32xf32>,
      %cst_48 = arith.constant 0.000000e+00 : f32
      %62 = vector.broadcast %cst_48 : f32 to vector<2x32xf32>
      %c0_49 = arith.constant 0 : index
      %c0_50 = arith.constant 0 : index
      %63 = vector.load %arg6[%c0_49, %c0_50] : memref<2x32xf32, #tpu.memory_space<vmem>>, vector<2x32xf32>
      tpu.vector_store %arg6[%c0_49, %c0_50], %62 {strides = array<i32>} : memref<2x32xf32, #tpu.memory_space<vmem>>, vector<2x32xf32>,
      %cst_51 = arith.constant 0.000000e+00 : f32
      %64 = vector.broadcast %cst_51 : f32 to vector<2x32xf32>
      %c0_52 = arith.constant 0 : index
      %c0_53 = arith.constant 0 : index
      %65 = vector.load %arg7[%c0_52, %c0_53] : memref<2x32xf32, #tpu.memory_space<vmem>>, vector<2x32xf32>
      tpu.vector_store %arg7[%c0_52, %c0_53], %64 {strides = array<i32>} : memref<2x32xf32, #tpu.memory_space<vmem>>, vector<2x32xf32>,
      %cst_54 = arith.constant 0xFF800000 : f32
      %66 = vector.broadcast %cst_54 : f32 to vector<2x32xf32>
      %c0_55 = arith.constant 0 : index
      %c0_56 = arith.constant 0 : index
      %67 = vector.load %arg8[%c0_55, %c0_56] : memref<2x32xf32, #tpu.memory_space<vmem>>, vector<2x32xf32>
      tpu.vector_store %arg8[%c0_55, %c0_56], %66 {strides = array<i32>} : memref<2x32xf32, #tpu.memory_space<vmem>>, vector<2x32xf32>,
      %cst_57 = arith.constant 0x7F800000 : f32
      %68 = vector.broadcast %cst_57 : f32 to vector<2x32xf32>
      %c0_58 = arith.constant 0 : index
      %c0_59 = arith.constant 0 : index
      %69 = vector.load %arg9[%c0_58, %c0_59] : memref<2x32xf32, #tpu.memory_space<vmem>>, vector<2x32xf32>
      tpu.vector_store %arg9[%c0_58, %c0_59], %68 {strides = array<i32>} : memref<2x32xf32, #tpu.memory_space<vmem>>, vector<2x32xf32>,
      %cst_60 = arith.constant 0.000000e+00 : f32
      %70 = vector.broadcast %cst_60 : f32 to vector<2x1xf32>
      %c0_61 = arith.constant 0 : index
      %c0_62 = arith.constant 0 : index
      %71 = vector.load %arg10[%c0_61, %c0_62] : memref<2x1xf32, #tpu.memory_space<vmem>>, vector<2x1xf32>
      tpu.vector_store %arg10[%c0_61, %c0_62], %70 {strides = array<i32>} : memref<2x1xf32, #tpu.memory_space<vmem>>, vector<2x1xf32>,
    } else {
    }
    %cst = arith.constant 0.000000e+00 : f32
    %9 = vector.shape_cast %3 : vector<8x2x1xi1> to vector<8x2x1xi1>
    %10 = vector.broadcast %9 : vector<8x2x1xi1> to vector<8x2x32xi1>
    %11 = vector.broadcast %cst : f32 to vector<8x2x32xf32>
    %12 = arith.select %10, %0, %11 : vector<8x2x32xi1>, vector<8x2x32xf32>
    %c0_7 = arith.constant 0 : index
    %c0_8 = arith.constant 0 : index
    %13 = vector.load %arg5[%c0_7, %c0_8] : memref<2x32xf32, #tpu.memory_space<vmem>>, vector<2x32xf32>
    %cst_9 = arith.constant dense<0.000000e+00> : vector<2x32xf32>
    %14 = vector.multi_reduction <add>, %12, %cst_9 [0] : vector<8x2x32xf32> to vector<2x32xf32>
    %15 = arith.addf %13, %14 : vector<2x32xf32>
    %c0_10 = arith.constant 0 : index
    %c0_11 = arith.constant 0 : index
    %16 = vector.load %arg5[%c0_10, %c0_11] : memref<2x32xf32, #tpu.memory_space<vmem>>, vector<2x32xf32>
    tpu.vector_store %arg5[%c0_10, %c0_11], %15 {strides = array<i32>} : memref<2x32xf32, #tpu.memory_space<vmem>>, vector<2x32xf32>,
    %c0_12 = arith.constant 0 : index
    %c0_13 = arith.constant 0 : index
    %17 = vector.load %arg6[%c0_12, %c0_13] : memref<2x32xf32, #tpu.memory_space<vmem>>, vector<2x32xf32>
    %18 = arith.mulf %12, %12 : vector<8x2x32xf32>
    %cst_14 = arith.constant dense<0.000000e+00> : vector<2x32xf32>
    %19 = vector.multi_reduction <add>, %18, %cst_14 [0] : vector<8x2x32xf32> to vector<2x32xf32>
    %20 = arith.addf %17, %19 : vector<2x32xf32>
    %c0_15 = arith.constant 0 : index
    %c0_16 = arith.constant 0 : index
    %21 = vector.load %arg6[%c0_15, %c0_16] : memref<2x32xf32, #tpu.memory_space<vmem>>, vector<2x32xf32>
    tpu.vector_store %arg6[%c0_15, %c0_16], %20 {strides = array<i32>} : memref<2x32xf32, #tpu.memory_space<vmem>>, vector<2x32xf32>,
    %c0_17 = arith.constant 0 : index
    %c0_18 = arith.constant 0 : index
    %22 = vector.load %arg7[%c0_17, %c0_18] : memref<2x32xf32, #tpu.memory_space<vmem>>, vector<2x32xf32>
    %cst_19 = arith.constant 0.000000e+00 : f32
    %23 = vector.shape_cast %5 : vector<8x2x1xi1> to vector<8x2x1xi1>
    %24 = vector.broadcast %23 : vector<8x2x1xi1> to vector<8x2x32xi1>
    %25 = vector.broadcast %cst_19 : f32 to vector<8x2x32xf32>
    %26 = arith.select %24, %0, %25 : vector<8x2x32xi1>, vector<8x2x32xf32>
    %cst_20 = arith.constant dense<0.000000e+00> : vector<2x32xf32>
    %27 = vector.multi_reduction <add>, %26, %cst_20 [0] : vector<8x2x32xf32> to vector<2x32xf32>
    %28 = arith.addf %22, %27 : vector<2x32xf32>
    %c0_21 = arith.constant 0 : index
    %c0_22 = arith.constant 0 : index
    %29 = vector.load %arg7[%c0_21, %c0_22] : memref<2x32xf32, #tpu.memory_space<vmem>>, vector<2x32xf32>
    tpu.vector_store %arg7[%c0_21, %c0_22], %28 {strides = array<i32>} : memref<2x32xf32, #tpu.memory_space<vmem>>, vector<2x32xf32>,
    %c0_23 = arith.constant 0 : index
    %c0_24 = arith.constant 0 : index
    %30 = vector.load %arg8[%c0_23, %c0_24] : memref<2x32xf32, #tpu.memory_space<vmem>>, vector<2x32xf32>
    %cst_25 = arith.constant 0xFF800000 : f32
    %31 = vector.shape_cast %3 : vector<8x2x1xi1> to vector<8x2x1xi1>
    %32 = vector.broadcast %31 : vector<8x2x1xi1> to vector<8x2x32xi1>
    %33 = vector.broadcast %cst_25 : f32 to vector<8x2x32xf32>
    %34 = arith.select %32, %0, %33 : vector<8x2x32xi1>, vector<8x2x32xf32>
    %cst_26 = arith.constant dense<0xFF800000> : vector<2x32xf32>
    %35 = vector.multi_reduction <maximumf>, %34, %cst_26 [0] : vector<8x2x32xf32> to vector<2x32xf32>
    %36 = arith.maximumf %30, %35 : vector<2x32xf32>
    %c0_27 = arith.constant 0 : index
    %c0_28 = arith.constant 0 : index
    %37 = vector.load %arg8[%c0_27, %c0_28] : memref<2x32xf32, #tpu.memory_space<vmem>>, vector<2x32xf32>
    tpu.vector_store %arg8[%c0_27, %c0_28], %36 {strides = array<i32>} : memref<2x32xf32, #tpu.memory_space<vmem>>, vector<2x32xf32>,
    %c0_29 = arith.constant 0 : index
    %c0_30 = arith.constant 0 : index
    %38 = vector.load %arg9[%c0_29, %c0_30] : memref<2x32xf32, #tpu.memory_space<vmem>>, vector<2x32xf32>
    %cst_31 = arith.constant 0x7F800000 : f32
    %39 = vector.shape_cast %3 : vector<8x2x1xi1> to vector<8x2x1xi1>
    %40 = vector.broadcast %39 : vector<8x2x1xi1> to vector<8x2x32xi1>
    %41 = vector.broadcast %cst_31 : f32 to vector<8x2x32xf32>
    %42 = arith.select %40, %0, %41 : vector<8x2x32xi1>, vector<8x2x32xf32>
    %cst_32 = arith.constant dense<0x7F800000> : vector<2x32xf32>
    %43 = vector.multi_reduction <minimumf>, %42, %cst_32 [0] : vector<8x2x32xf32> to vector<2x32xf32>
    %44 = arith.minimumf %38, %43 : vector<2x32xf32>
    %c0_33 = arith.constant 0 : index
    %c0_34 = arith.constant 0 : index
    %45 = vector.load %arg9[%c0_33, %c0_34] : memref<2x32xf32, #tpu.memory_space<vmem>>, vector<2x32xf32>
    tpu.vector_store %arg9[%c0_33, %c0_34], %44 {strides = array<i32>} : memref<2x32xf32, #tpu.memory_space<vmem>>, vector<2x32xf32>,
    %c0_35 = arith.constant 0 : index
    %c0_36 = arith.constant 0 : index
    %46 = vector.load %arg10[%c0_35, %c0_36] : memref<2x1xf32, #tpu.memory_space<vmem>>, vector<2x1xf32>
    %47 = arith.extui %3 : vector<8x2x1xi1> to vector<8x2x1xi32>
    %48 = arith.sitofp %47 : vector<8x2x1xi32> to vector<8x2x1xf32>
    %cst_37 = arith.constant dense<0.000000e+00> : vector<2x1xf32>
    %49 = vector.multi_reduction <add>, %48, %cst_37 [0] : vector<8x2x1xf32> to vector<2x1xf32>
    %50 = arith.addf %46, %49 : vector<2x1xf32>
    %c0_38 = arith.constant 0 : index
    %c0_39 = arith.constant 0 : index
    %51 = vector.load %arg10[%c0_38, %c0_39] : memref<2x1xf32, #tpu.memory_space<vmem>>, vector<2x1xf32>
    tpu.vector_store %arg10[%c0_38, %c0_39], %50 {strides = array<i32>} : memref<2x1xf32, #tpu.memory_space<vmem>>, vector<2x1xf32>,
    %c0_i32_40 = arith.constant 0 : i32
    %52 = arith.cmpi eq, %arg1, %c0_i32_40 : i32
    %53 = arith.extui %52 : i1 to i32
    %c0_i32_41 = arith.constant 0 : i32
    %54 = arith.cmpi ne, %53, %c0_i32_41 : i32
    scf.if %54 {
      %c0_42 = arith.constant 0 : index
      %c0_43 = arith.constant 0 : index
      %55 = vector.load %arg10[%c0_42, %c0_43] : memref<2x1xf32, #tpu.memory_space<vmem>>, vector<2x1xf32>
      %cst_44 = arith.constant 1.000000e+00 : f32
      %56 = vector.broadcast %cst_44 : f32 to vector<2x1xf32>
      %57 = arith.maximumf %55, %56 : vector<2x1xf32>
      %cst_45 = arith.constant 1.000000e+00 : f32
      %58 = vector.broadcast %cst_45 : f32 to vector<2x1xf32>
      %59 = arith.divf %58, %57 : vector<2x1xf32>
      %c0_46 = arith.constant 0 : index
      %c0_47 = arith.constant 0 : index
      %60 = vector.load %arg5[%c0_46, %c0_47] : memref<2x32xf32, #tpu.memory_space<vmem>>, vector<2x32xf32>
      %61 = vector.broadcast %59 : vector<2x1xf32> to vector<2x32xf32>
      %62 = arith.mulf %60, %61 : vector<2x32xf32>
      %c0_48 = arith.constant 0 : index
      %c0_49 = arith.constant 0 : index
      %63 = vector.load %arg6[%c0_48, %c0_49] : memref<2x32xf32, #tpu.memory_space<vmem>>, vector<2x32xf32>
      %64 = vector.broadcast %59 : vector<2x1xf32> to vector<2x32xf32>
      %65 = arith.mulf %63, %64 : vector<2x32xf32>
      %66 = arith.mulf %62, %62 : vector<2x32xf32>
      %67 = arith.subf %65, %66 : vector<2x32xf32>
      %cst_50 = arith.constant 0.000000e+00 : f32
      %68 = vector.broadcast %cst_50 : f32 to vector<2x32xf32>
      %69 = arith.maximumf %67, %68 : vector<2x32xf32>
      %70 = math.sqrt %69 : vector<2x32xf32>
      %c1 = arith.constant 1 : index
      %c0_51 = arith.constant 0 : index
      %c0_52 = arith.constant 0 : index
      %71 = vector.load %arg4[%c1, %c0_51, %c0_52] : memref<6x2x32xf32, #tpu.memory_space<vmem>>, vector<1x2x32xf32>
      %72 = vector.shape_cast %71 : vector<1x2x32xf32> to vector<2x32xf32>
      %73 = vector.shape_cast %62 : vector<2x32xf32> to vector<1x2x32xf32>
      tpu.vector_store %arg4[%c1, %c0_51, %c0_52], %73 {strides = array<i32>} : memref<6x2x32xf32, #tpu.memory_space<vmem>>, vector<1x2x32xf32>,
      %c0_53 = arith.constant 0 : index
      %c0_54 = arith.constant 0 : index
      %74 = vector.load %arg7[%c0_53, %c0_54] : memref<2x32xf32, #tpu.memory_space<vmem>>, vector<2x32xf32>
      %c2 = arith.constant 2 : index
      %c0_55 = arith.constant 0 : index
      %c0_56 = arith.constant 0 : index
      %75 = vector.load %arg4[%c2, %c0_55, %c0_56] : memref<6x2x32xf32, #tpu.memory_space<vmem>>, vector<1x2x32xf32>
      %76 = vector.shape_cast %75 : vector<1x2x32xf32> to vector<2x32xf32>
      %77 = vector.shape_cast %74 : vector<2x32xf32> to vector<1x2x32xf32>
      tpu.vector_store %arg4[%c2, %c0_55, %c0_56], %77 {strides = array<i32>} : memref<6x2x32xf32, #tpu.memory_space<vmem>>, vector<1x2x32xf32>,
      %c0_57 = arith.constant 0 : index
      %c0_58 = arith.constant 0 : index
      %78 = vector.load %arg8[%c0_57, %c0_58] : memref<2x32xf32, #tpu.memory_space<vmem>>, vector<2x32xf32>
      %c3 = arith.constant 3 : index
      %c0_59 = arith.constant 0 : index
      %c0_60 = arith.constant 0 : index
      %79 = vector.load %arg4[%c3, %c0_59, %c0_60] : memref<6x2x32xf32, #tpu.memory_space<vmem>>, vector<1x2x32xf32>
      %80 = vector.shape_cast %79 : vector<1x2x32xf32> to vector<2x32xf32>
      %81 = vector.shape_cast %78 : vector<2x32xf32> to vector<1x2x32xf32>
      tpu.vector_store %arg4[%c3, %c0_59, %c0_60], %81 {strides = array<i32>} : memref<6x2x32xf32, #tpu.memory_space<vmem>>, vector<1x2x32xf32>,
      %c0_61 = arith.constant 0 : index
      %c0_62 = arith.constant 0 : index
      %82 = vector.load %arg9[%c0_61, %c0_62] : memref<2x32xf32, #tpu.memory_space<vmem>>, vector<2x32xf32>
      %c4 = arith.constant 4 : index
      %c0_63 = arith.constant 0 : index
      %c0_64 = arith.constant 0 : index
      %83 = vector.load %arg4[%c4, %c0_63, %c0_64] : memref<6x2x32xf32, #tpu.memory_space<vmem>>, vector<1x2x32xf32>
      %84 = vector.shape_cast %83 : vector<1x2x32xf32> to vector<2x32xf32>
      %85 = vector.shape_cast %82 : vector<2x32xf32> to vector<1x2x32xf32>
      tpu.vector_store %arg4[%c4, %c0_63, %c0_64], %85 {strides = array<i32>} : memref<6x2x32xf32, #tpu.memory_space<vmem>>, vector<1x2x32xf32>,
      %c5 = arith.constant 5 : index
      %c0_65 = arith.constant 0 : index
      %c0_66 = arith.constant 0 : index
      %86 = vector.load %arg4[%c5, %c0_65, %c0_66] : memref<6x2x32xf32, #tpu.memory_space<vmem>>, vector<1x2x32xf32>
      %87 = vector.shape_cast %86 : vector<1x2x32xf32> to vector<2x32xf32>
      %88 = vector.shape_cast %70 : vector<2x32xf32> to vector<1x2x32xf32>
      tpu.vector_store %arg4[%c5, %c0_65, %c0_66], %88 {strides = array<i32>} : memref<6x2x32xf32, #tpu.memory_space<vmem>>, vector<1x2x32xf32>,
    } else {
    }
    return
  }
  func.func @transform_0(%arg0: i32, %arg1: i32) -> (i32, i32, i32) {
    %c0_i32 = arith.constant 0 : i32
    %c0_i32_0 = arith.constant 0 : i32
    return %arg1, %arg0, %c0_i32 : i32, i32, i32
  }
  func.func @transform_1(%arg0: i32, %arg1: i32) -> (i32, i32, i32) {
    %c0_i32 = arith.constant 0 : i32
    %c0_i32_0 = arith.constant 0 : i32
    return %arg1, %arg0, %c0_i32 : i32, i32, i32
  }
  func.func @transform_2(%arg0: i32, %arg1: i32) -> (i32, i32, i32) {
    %c0_i32 = arith.constant 0 : i32
    %c0_i32_0 = arith.constant 0 : i32
    %c0_i32_1 = arith.constant 0 : i32
    return %c0_i32, %arg0, %c0_i32_0 : i32, i32, i32
  }
}

</mosaic_0001>

<bundles_post_ra>
// kernel: tpu_custom_call.1
= control target key start
LH: loop header
LB: loop body
LE: loop exit
PB: predicated region body
PF: predicated region fallthrough
CT: control target
= control target key end

     0   :  { %vm55_vm0 = vcmask 1024   ;;  %v418_v1 = vmov 0   ;;  %v419_v2 = vmov 0.0   ;;  %s690_s0 = inlined_call_operand.vmem [shape: f32[8,2,32], index: 0, kind: input, shape index: {}]   ;;  %s691_s1 = inlined_call_operand.vmem [shape: s32[8,2,1], index: 1, kind: input, shape index: {}]   ;;  %s692_s2 = inlined_call_operand.hbm [shape: f32[6,2,32], index: 2, kind: output, shape index: {}]  }
   0x1   :  { %v443_v0 = vld [vmem:[%s691_s1 + $0x4] sm:$0x3]  ;;  %386 = vset.pattern.permute.xlu1 %v418_v1  ;;  %385 = vset.pattern.permute.xlu0 %v418_v1  ;;  %56 = vst.msk [vmem:[#allocation7] sm:$0x3] %vm55_vm0, %v419_v2  ;;  %v20_v3 = vld [vmem:[%s691_s1] sm:$0x3] }
   0x2   :  { %vm30_vm1 = vcmp.ne.s32.totalorder %v443_v0, 0  ;;  %vm28_vm2 = vcmp.ne.s32.totalorder %v20_v3, 0  ;;  %v457_v5 = vld [vmem:[%s691_s1 + $0x6] sm:$0x3]  ;;  %387 = vset.pattern.permute.xlu2 %v418_v1  ;;  %v21_v9 = vld [vmem:[%s691_s1 + $0x2] sm:$0x3] }
   0x3   :  { %v59_v4 = vsel %vm30_vm1, 1, %v418_v1  ;;  %v372_v6 = vsel %vm30_vm1, 1.0, %v419_v2  ;;  %v57_v7 = vsel %vm28_vm2, 1, %v418_v1  ;;  %v370_v8 = vsel %vm28_vm2, 1.0, %v419_v2  ;;  %v473_v13 = vld [vmem:[%s691_s1 + $0xc] sm:$0x3] }
   0x4   :  { %72 = vperm.xlu1 %386, %v59_v4   ;;  %vm31_vm3 = vcmp.ne.s32.totalorder %v457_v5, 0  ;;  %v278_v10 = vsel %vm55_vm0, %v370_v8, 0.0  ;;  %66 = vperm.xlu0 %385, %v57_v7   ;;  %vm29_vm4 = vcmp.ne.s32.totalorder %v21_v9, 0  ;;  %v281_v14 = vsel %vm55_vm0, %v372_v6, 0.0  ;;  %v24_v16 = vld [vmem:[%s691_s1 + $0x8] sm:$0x3] }
   0x5   :  { %v373_v11 = vsel %vm31_vm3, 1.0, %v419_v2  ;;  %v371_v12 = vsel %vm29_vm4, 1.0, %v419_v2  ;;  %v27_v18 = vld [vmem:[%s691_s1 + $0xe] sm:$0x3]  ;;  %v486_v19 = vld [vmem:[%s691_s1 + $0xa] sm:$0x3] }
   0x6   :  { %v279_v15 = vsel %vm55_vm0, %v371_v12, 0.0  ;;  %v60_v20 = vsel %vm31_vm3, 1, %v418_v1  ;;  %v283_v21 = vsel %vm55_vm0, %v373_v11, 0.0  ;;  %vm34_vm5 = vcmp.ne.s32.totalorder %v473_v13, 0 }
   0x7   :  { %v280_v17 = vadd.f32 %v279_v15, %v278_v10  ;;  %vm32_vm6 = vcmp.ne.s32.totalorder %v24_v16, 0  ;;  %v58_v22 = vsel %vm29_vm4, 1, %v418_v1 }
   0x8   :  { %v61_v24 = vsel %vm32_vm6, 1, %v418_v1  ;;  %v374_v25 = vsel %vm32_vm6, 1.0, %v419_v2 }
   0x9   :  { %v282_v23 = vadd.f32 %v281_v14, %v280_v17 }
   0xa   :  { %7 = vsyncpa [#allocation9], 0  ;;  %vm35_vm7 = vcmp.ne.s32.totalorder %v27_v18, 0  ;;  %v285_v26 = vsel %vm55_vm0, %v374_v25, 0.0  ;;  %78 = vperm.xlu2 %387, %v61_v24   ;;  %vm33_vm8 = vcmp.ne.s32.totalorder %v486_v19, 0  ;;  %v376_v27 = vsel %vm34_vm5, 1.0, %v419_v2 }
   0xb   :  { %v284_v28 = vadd.f32 %v283_v21, %v282_v23  ;;  %v375_v29 = vsel %vm33_vm8, 1.0, %v419_v2  ;;  %v377_v31 = vsel %vm35_vm7, 1.0, %v419_v2  ;;  %v289_v33 = vsel %vm55_vm0, %v376_v27, 0.0  ;;  %v268_v40 = vld [vmem:[#allocation7] sm:$0x3]  ;;  %s358_s15 = sshll.u32 %s692_s2, 4  ;;  %s359_s15 = int_to_ptr.hbm [resolvable:$true] %s358_s15 }
   0xc   :  { %75 = vperm.xlu1 %386, %v60_v20   ;;  %69 = vperm.xlu0 %385, %v58_v22   ;;  %v287_v30 = vsel %vm55_vm0, %v375_v29, 0.0  ;;  %v62_v34 = vsel %vm33_vm8, 1, %v418_v1  ;;  %v64_v36 = vsel %vm35_vm7, 1, %v418_v1  ;;  %v291_v37 = vsel %vm55_vm0, %v377_v31, 0.0  ;;  %v531_v63 = vld [vmem:[%s690_s0] sm:$0x3] }
   0xd   :  { %v286_v32 = vadd.f32 %v285_v26, %v284_v28  ;;  %v63_v38 = vsel %vm34_vm5, 1, %v418_v1  ;;  %vm37_vm9 = vcmp.eq.s32.totalorder %v21_v9, 1  ;;  %vm36_vm10 = vcmp.eq.s32.totalorder %v20_v3, 1  ;;  %v551_v8 = vld [vmem:[%s690_s0 + $0x4] sm:$0x3]  ;;  %s423_s16 = smov 32  }
   0xe   :  { %v152_v43 = vsel %vm37_vm9, 1, %v418_v1  ;;  %v151_v44 = vsel %vm36_vm10, 1, %v418_v1  ;;  %vm40_vm11 = vcmp.eq.s32.totalorder %v24_v16, 1  ;;  %vm39_vm12 = vcmp.eq.s32.totalorder %v457_v5, 1  ;;  %v545_v5 = vld [vmem:[%s690_s0 + $0xa] sm:$0x3] }
   0xf   :  { %v288_v35 = vadd.f32 %v287_v30, %v286_v32  ;;  %v155_v47 = vsel %vm40_vm11, 1, %v418_v1  ;;  %v154_v48 = vsel %vm39_vm12, 1, %v418_v1  ;;  %vm48_vm13 = vcmask 254976   ;;  %v589_v31 = vld [vmem:[%s690_s0 + $0x6] sm:$0x3]  ;;  %s424_s17 = smov 2  }
  0x10   :  { %50 = vst.msk [vmem:[#allocation2] sm:$0x3] %vm48_vm13, %v419_v2  ;;  %vm43_vm14 = vcmp.eq.s32.totalorder %v27_v18, 1  ;;  %vm42_vm15 = vcmp.eq.s32.totalorder %v473_v13, 1  ;;  %vm38_vm4 = vcmp.eq.s32.totalorder %v443_v0, 1  ;;  %vm41_vm5 = vcmp.eq.s32.totalorder %v486_v19, 1 }
  0x11   :  { %v290_v39 = vadd.f32 %v289_v33, %v288_v35  ;;  %51 = vst.msk [vmem:[#allocation3] sm:$0x3] %vm48_vm13, %v419_v2  ;;  %v158_v50 = vsel %vm43_vm14, 1, %v418_v1  ;;  %v157_v52 = vsel %vm42_vm15, 1, %v418_v1  ;;  %v153_v61 = vsel %vm38_vm4, 1, %v418_v1 }
  0x12   :  { %81 = vperm.xlu2 %387, %v62_v34   ;;  %52 = vst.msk [vmem:[#allocation4] sm:$0x3] %vm48_vm13, %v419_v2  ;;  %v156_v62 = vsel %vm41_vm5, 1, %v418_v1  ;;  %v420_v3 = vmov -inf   ;;  %v421_v0 = vmov inf  }
  0x13   :  { %v292_v41 = vadd.f32 %v291_v37, %v290_v39  ;;  %49 = vst.msk [vmem:[#allocation8] sm:$0x3] %vm48_vm13, %v531_v63  ;;  %v540_v1 = vld [vmem:[%s690_s0 + $0x8] sm:$0x3] }
  0x14   :  { %87 = vperm.xlu1 %386, %v64_v36   ;;  %84 = vperm.xlu0 %385, %v63_v38   ;;  %53 = vst.msk [vmem:[#allocation5] sm:$0x3] %vm48_vm13, %v420_v3  ;;  %v599_v36 = vld [vmem:[%s690_s0 + $0x2] sm:$0x3] }
  0x15   :  { %v293_v42 = vadd.f32 %v292_v41, %v268_v40  ;;  %54 = vst.msk [vmem:[#allocation6] sm:$0x3] %vm48_vm13, %v421_v0 }
  0x17   :  { %294 = vst.msk [vmem:[#allocation7] sm:$0x3] %vm55_vm0, %v293_v42 }
  0x1c   :  { %163 = vperm.xlu1 %386, %v152_v43   ;;  %160 = vperm.xlu0 %385, %v151_v44  }
  0x1e   :  { %v298_v45 = vld [vmem:[#allocation7] sm:$0x3] }
  0x1f   :  { %v299_v46 = vmax.f32 %v298_v45, 1.0 }
  0x21   :  { %388 = vrcp.f32 %v299_v46  ;;  %v311_v53 = vand.u32 2147483648, %v299_v46  ;;  %vm305_vm0 = vweird.f32 %v299_v46  ;;  %v309_v55 = vand.u32 2147483647, %v299_v46 }
  0x23   :  { %v312_v57 = vor.u32 1.1754944e-38, %v311_v53  ;;  %vm310_vm3 = vcmp.eq.f32.partialorder %v309_v55, 8.507059e+37 }
  0x24   :  { %172 = vperm.xlu1 %386, %v155_v47   ;;  %169 = vperm.xlu0 %385, %v154_v48  }
  0x27   :  { %v389_v49 = vpop.eup %388 }
  0x28   :  { %v301_v51 = vmul.f32 %v389_v49, %v299_v46  ;;  %vm306_vm1 = vweird.f32 %v389_v49 }
  0x29   :  { %vm307_vm2 = vmor %vm305_vm0, %vm306_vm1 }
  0x2a   :  { %v302_v54 = vsub.f32 1.0, %v301_v51 }
  0x2c   :  { %181 = vperm.xlu1 %386, %v158_v50   ;;  %178 = vperm.xlu0 %385, %v157_v52   ;;  %v303_v56 = vmul.f32 %v389_v49, %v302_v54 }
  0x2e   :  { %v304_v58 = vadd.f32 %v389_v49, %v303_v56 }
  0x30   :  { %v308_v59 = vsel %vm307_vm2, %v389_v49, %v304_v58 }
  0x31   :  { %v313_v60 = vsel %vm310_vm3, %v312_v57, %v308_v59 }
  0x32   :  { %318 = vperm.xlu2 %387, %v313_v60   ;;  %v629_v60 = vld [vmem:[%s690_s0 + $0xe] sm:$0x3] }
  0x3a   :  { %166 = vperm.xlu2 %387, %v153_v61  }
  0x42   :  { %175 = vperm.xlu2 %387, %v156_v62  }
  0x64   :  { %v79_v2 = vpop.permute.xlu2 %78 }
  0x65   :  { %vm93_vm6 = vcmp.eq.s32.totalorder %v79_v2, 1 }
  0x66   :  { %v101_v6 = vsel %vm93_vm6, %v540_v1, 0.0  ;;  %v221_v12 = vsel %vm93_vm6, %v540_v1, -inf  ;;  %v247_v13 = vsel %vm93_vm6, %v540_v1, inf }
  0x67   :  { %v129_v11 = vmul.f32 %v101_v6, %v101_v6  ;;  %v564_v18 = vsel %vm48_vm13, %v101_v6, 0.0  ;;  %v229_v19 = vsel %vm48_vm13, %v221_v12, -inf  ;;  %v568_v20 = vsel %vm48_vm13, %v247_v13, inf }
  0x69   :  { %v573_v22 = vsel %vm48_vm13, %v129_v11, 0.0 }
  0x6c   :  { %v82_v4 = vpop.permute.xlu2 %81 }
  0x6d   :  { %vm94_vm7 = vcmp.eq.s32.totalorder %v82_v4, 1 }
  0x6e   :  { %v102_v10 = vsel %vm94_vm7, %v545_v5, 0.0  ;;  %v222_v17 = vsel %vm94_vm7, %v545_v5, -inf  ;;  %v248_v21 = vsel %vm94_vm7, %v545_v5, inf }
  0x6f   :  { %v130_v16 = vmul.f32 %v102_v10, %v102_v10  ;;  %v583_v28 = vsel %vm48_vm13, %v102_v10, 0.0  ;;  %v231_v29 = vsel %vm48_vm13, %v222_v17, -inf  ;;  %v257_v34 = vsel %vm48_vm13, %v248_v21, inf }
  0x71   :  { %v593_v33 = vsel %vm48_vm13, %v130_v16, 0.0 }
  0x76   :  { %v73_v7 = vpop.permute.xlu1 %72  ;;  %v67_v9 = vpop.permute.xlu0 %66 }
  0x77   :  { %vm91_vm8 = vcmp.eq.s32.totalorder %v73_v7, 1  ;;  %vm89_vm9 = vcmp.eq.s32.totalorder %v67_v9, 1 }
  0x78   :  { %v99_v14 = vsel %vm91_vm8, %v551_v8, 0.0  ;;  %v217_v15 = vsel %vm89_vm9, %v531_v63, -inf  ;;  %v219_v24 = vsel %vm91_vm8, %v551_v8, -inf  ;;  %v245_v25 = vsel %vm91_vm8, %v551_v8, inf }
  0x79   :  { %v127_v23 = vmul.f32 %v99_v14, %v99_v14  ;;  %v97_v26 = vsel %vm89_vm9, %v531_v63, 0.0  ;;  %v225_v27 = vsel %vm48_vm13, %v217_v15, -inf  ;;  %v110_v32 = vsel %vm48_vm13, %v99_v14, 0.0  ;;  %v640_v14 = vld [vmem:[%s690_s0 + $0xc] sm:$0x3]  ;;  %s422_s0 = smov [#allocation8]  }
  0x7a   :  { %v602_v37 = vsel %vm48_vm13, %v219_v24, -inf  ;;  %v605_v38 = vsel %vm48_vm13, %v245_v25, inf  ;;  %v243_v39 = vsel %vm89_vm9, %v531_v63, inf  ;;  %v107_v41 = vsel %vm48_vm13, %v97_v26, 0.0  ;;  %s356_s12 = sshll.u32 %s422_s0, 4  ;;  %s357_s12 = int_to_ptr.vmem [resolvable:$true] %s356_s12 }
  0x7b   :  { %v136_v40 = vsel %vm48_vm13, %v127_v23, 0.0  ;;  %v125_v42 = vmul.f32 %v97_v26, %v97_v26  ;;  %v230_v43 = vmax.f32 %v225_v27, %v229_v19  ;;  %v251_v48 = vsel %vm48_vm13, %v243_v39, inf }
  0x7c   :  { %v256_v61 = vmin.f32 %v251_v48, %v568_v20 }
  0x7d   :  { %v133_v56 = vsel %vm48_vm13, %v125_v42, 0.0 }
  0x7e   :  { %v76_v30 = vpop.permute.xlu1 %75  ;;  %v70_v35 = vpop.permute.xlu0 %69 }
  0x7f   :  { %vm92_vm10 = vcmp.eq.s32.totalorder %v76_v30, 1  ;;  %vm90_vm11 = vcmp.eq.s32.totalorder %v70_v35, 1 }
  0x80   :  { %v100_v44 = vsel %vm92_vm10, %v589_v31, 0.0  ;;  %v98_v45 = vsel %vm90_vm11, %v599_v36, 0.0  ;;  %v218_v46 = vsel %vm90_vm11, %v599_v36, -inf  ;;  %v244_v47 = vsel %vm90_vm11, %v599_v36, inf }
  0x81   :  { %v108_v49 = vsel %vm48_vm13, %v98_v45, 0.0  ;;  %v126_v50 = vmul.f32 %v98_v45, %v98_v45  ;;  %v226_v51 = vsel %vm48_vm13, %v218_v46, -inf  ;;  %v220_v52 = vsel %vm92_vm10, %v589_v31, -inf }
  0x82   :  { %v246_v53 = vsel %vm92_vm10, %v589_v31, inf  ;;  %v109_v54 = vadd.f32 %v108_v49, %v107_v41  ;;  %v252_v55 = vsel %vm48_vm13, %v244_v47, inf  ;;  %v128_v57 = vmul.f32 %v100_v44, %v100_v44 }
  0x83   :  { %v134_v58 = vsel %vm48_vm13, %v126_v50, 0.0  ;;  %v232_v59 = vmax.f32 %v226_v51, %v231_v29  ;;  %v258_v3 = vmin.f32 %v252_v55, %v257_v34  ;;  %v112_v4 = vsel %vm48_vm13, %v100_v44, 0.0  ;;  %v105_v50 = vld [vmem:[#allocation2] sm:$0x3] }
  0x84   :  { %v111_v62 = vadd.f32 %v110_v32, %v109_v54  ;;  %v135_v2 = vadd.f32 %v134_v58, %v133_v56  ;;  %v228_v6 = vsel %vm48_vm13, %v220_v52, -inf  ;;  %v254_v7 = vsel %vm48_vm13, %v246_v53, inf  ;;  %v124_v53 = vld [vmem:[#allocation3] sm:$0x3] }
  0x85   :  { %v138_v15 = vsel %vm48_vm13, %v128_v57, 0.0  ;;  %v237_v16 = vmax.f32 %v230_v43, %v232_v59  ;;  %v263_v21 = vmin.f32 %v256_v61, %v258_v3  ;;  %v242_v57 = vld [vmem:[#allocation6] sm:$0x3] }
  0x86   :  { %v88_v0 = vpop.permute.xlu1 %87  ;;  %v85_v9 = vpop.permute.xlu0 %84  ;;  %v113_v10 = vadd.f32 %v112_v4, %v111_v62  ;;  %v137_v11 = vadd.f32 %v136_v40, %v135_v2 }
  0x87   :  { %vm96_vm12 = vcmp.eq.s32.totalorder %v88_v0, 1  ;;  %vm95_vm14 = vcmp.eq.s32.totalorder %v85_v9, 1 }
  0x88   :  { %v104_v12 = vsel %vm96_vm12, %v629_v60, 0.0  ;;  %v224_v13 = vsel %vm96_vm12, %v629_v60, -inf  ;;  %v250_v19 = vsel %vm96_vm12, %v629_v60, inf  ;;  %v139_v20 = vadd.f32 %v138_v15, %v137_v11 }
  0x89   :  { %v235_v17 = vsel %vm48_vm13, %v224_v13, -inf  ;;  %v261_v23 = vsel %vm48_vm13, %v250_v19, inf  ;;  %v120_v24 = vsel %vm48_vm13, %v104_v12, 0.0  ;;  %v132_v25 = vmul.f32 %v104_v12, %v104_v12 }
  0x8a   :  { %v103_v26 = vsel %vm95_vm14, %v640_v14, 0.0  ;;  %v115_v27 = vadd.f32 %v564_v18, %v113_v10  ;;  %v236_v29 = vmax.f32 %v228_v6, %v235_v17  ;;  %v141_v32 = vadd.f32 %v573_v22, %v139_v20 }
  0x8b   :  { %v131_v30 = vmul.f32 %v103_v26, %v103_v26  ;;  %v223_v34 = vsel %vm95_vm14, %v640_v14, -inf  ;;  %v262_v35 = vmin.f32 %v254_v7, %v261_v23  ;;  %v249_v41 = vsel %vm95_vm14, %v640_v14, inf }
  0x8c   :  { %v117_v39 = vadd.f32 %v583_v28, %v115_v27  ;;  %v233_v40 = vsel %vm48_vm13, %v223_v34, -inf  ;;  %v319_v42 = vpop.permute.xlu2 %318  ;;  %v118_v43 = vsel %vm48_vm13, %v103_v26, 0.0  ;;  %v143_v44 = vadd.f32 %v593_v33, %v141_v32  ;;  %v216_v33 = vld [vmem:[#allocation5] sm:$0x3] }
  0x8d   :  { %v234_v18 = vmax.f32 %v602_v37, %v233_v40  ;;  %v259_v45 = vsel %vm48_vm13, %v249_v41, inf  ;;  %v144_v47 = vsel %vm48_vm13, %v131_v30, 0.0  ;;  %v146_v49 = vsel %vm48_vm13, %v132_v25, 0.0 }
  0x8e   :  { %v164_v46 = vpop.permute.xlu1 %163  ;;  %v119_v22 = vadd.f32 %v118_v43, %v117_v39  ;;  %v260_v48 = vmin.f32 %v605_v38, %v259_v45  ;;  %v161_v28 = vpop.permute.xlu0 %160  ;;  %v145_v51 = vadd.f32 %v144_v47, %v143_v44  ;;  %v150_v43 = vld [vmem:[#allocation4] sm:$0x3] }
  0x8f   :  { %vm184_vm15 = vcmp.eq.s32.totalorder %v164_v46, 1  ;;  %v238_v52 = vmax.f32 %v234_v18, %v236_v29  ;;  %vm183_vm0 = vcmp.eq.s32.totalorder %v161_v28, 1 }
  0x90   :  { %v121_v54 = vadd.f32 %v120_v24, %v119_v22  ;;  %v264_v37 = vmin.f32 %v260_v48, %v262_v35  ;;  %v192_v55 = vsel %vm184_vm15, %v599_v36, 0.0  ;;  %v191_v56 = vsel %vm183_vm0, %v531_v63, 0.0 }
  0x91   :  { %v147_v58 = vadd.f32 %v146_v49, %v145_v51  ;;  %v239_v59 = vmax.f32 %v237_v16, %v238_v52  ;;  %v200_v3 = vsel %vm48_vm13, %v192_v55, 0.0  ;;  %v199_v0 = vsel %vm48_vm13, %v191_v56, 0.0 }
  0x92   :  { %v122_v38 = vadd.f32 %v121_v54, %v105_v50  ;;  %v265_v61 = vmin.f32 %v263_v21, %v264_v37  ;;  %v201_v63 = vadd.f32 %v200_v3, %v199_v0 }
  0x93   :  { %v148_v62 = vadd.f32 %v147_v58, %v124_v53  ;;  %v240_v2 = vmax.f32 %v216_v33, %v239_v59 }
  0x94   :  { %123 = vst.msk [vmem:[#allocation2] sm:$0x3] %vm48_vm13, %v122_v38  ;;  %v266_v4 = vmin.f32 %v242_v57, %v265_v61  ;;  %v167_v6 = vpop.permute.xlu2 %166 }
  0x95   :  { %149 = vst.msk [vmem:[#allocation3] sm:$0x3] %vm48_vm13, %v148_v62  ;;  %vm185_vm1 = vcmp.eq.s32.totalorder %v167_v6, 1 }
  0x96   :  { %v173_v36 = vpop.permute.xlu1 %172  ;;  %241 = vst.msk [vmem:[#allocation5] sm:$0x3] %vm48_vm13, %v240_v2  ;;  %v193_v7 = vsel %vm185_vm1, %v551_v8, 0.0  ;;  %v170_v9 = vpop.permute.xlu0 %169 }
  0x97   :  { %vm187_vm2 = vcmp.eq.s32.totalorder %v173_v36, 1  ;;  %267 = vst.msk [vmem:[#allocation6] sm:$0x3] %vm48_vm13, %v266_v4  ;;  %v202_v10 = vsel %vm48_vm13, %v193_v7, 0.0  ;;  %vm186_vm3 = vcmp.eq.s32.totalorder %v170_v9, 1 }
  0x98   :  { %v203_v11 = vadd.f32 %v202_v10, %v201_v63  ;;  %v195_v12 = vsel %vm187_vm2, %v540_v1, 0.0  ;;  %v194_v13 = vsel %vm186_vm3, %v589_v31, 0.0 }
  0x99   :  { %v204_v15 = vsel %vm48_vm13, %v194_v13, 0.0  ;;  %v206_v19 = vsel %vm48_vm13, %v195_v12, 0.0 }
  0x9a   :  { %v205_v16 = vadd.f32 %v204_v15, %v203_v11 }
  0x9b   :  { %v315_v17 = vld [vmem:[#allocation2] sm:$0x3] }
  0x9c   :  { %v321_v20 = vmul.f32 %v319_v42, %v315_v17  ;;  %v322_v8 = vld [vmem:[#allocation3] sm:$0x3]  ;;  %v176_v21 = vpop.permute.xlu2 %175  ;;  %v207_v23 = vadd.f32 %v206_v19, %v205_v16 }
  0x9d   :  { %v323_v24 = vmul.f32 %v322_v8, %v319_v42  ;;  %vm188_vm4 = vcmp.eq.s32.totalorder %v176_v21, 1  ;;  %v344_v26 = vld [vmem:[#allocation5] sm:$0x3] }
  0x9e   :  { %v182_v25 = vpop.permute.xlu1 %181  ;;  %v324_v27 = vmul.f32 %v321_v20, %v321_v20  ;;  %340 = vst.msk [vmem:[#allocation8 + $0x2] sm:$0x3] %vm48_vm13, %v321_v20  ;;  %v196_v1 = vsel %vm188_vm4, %v545_v5, 0.0  ;;  %v179_v31 = vpop.permute.xlu0 %178  ;;  %v347_v29 = vld [vmem:[#allocation6] sm:$0x3] }
  0x9f   :  { %vm190_vm5 = vcmp.eq.s32.totalorder %v182_v25, 1  ;;  %v208_v30 = vsel %vm48_vm13, %v196_v1, 0.0  ;;  %vm189_vm6 = vcmp.eq.s32.totalorder %v179_v31, 1  ;;  %346 = vst.msk [vmem:[#allocation8 + $0x6] sm:$0x3] %vm48_vm13, %v344_v26 }
  0xa0   :  { %v325_v32 = vsub.f32 %v323_v24, %v324_v27  ;;  %v209_v34 = vadd.f32 %v208_v30, %v207_v23  ;;  %v197_v35 = vsel %vm189_vm6, %v640_v14, 0.0  ;;  %349 = vst.msk [vmem:[#allocation8 + $0x8] sm:$0x3] %vm48_vm13, %v347_v29  ;;  %v198_v39 = vsel %vm190_vm5, %v629_v60, 0.0 }
  0xa1   :  { %v210_v40 = vsel %vm48_vm13, %v197_v35, 0.0  ;;  %v212_v42 = vsel %vm48_vm13, %v198_v39, 0.0 }
  0xa2   :  { %v326_v41 = vmax.f32 %v325_v32, 0.0  ;;  %v211_v5 = vadd.f32 %v210_v40, %v209_v34 }
  0xa4   :  { %390 = vrsqrt.f32 %v326_v41  ;;  %v213_v44 = vadd.f32 %v212_v42, %v211_v5  ;;  %vm334_vm7 = vcmp.eq.f32.partialorder %v326_v41, inf  ;;  %v337_v49 = vand.u32 2147483648, %v326_v41 }
  0xa5   :  { %vm336_vm8 = vcmp.eq.f32.partialorder %v326_v41, 0.0 }
  0xa6   :  { %v214_v18 = vadd.f32 %v213_v44, %v150_v43 }
  0xa8   :  { %215 = vst.msk [vmem:[#allocation4] sm:$0x3] %vm48_vm13, %v214_v18 }
  0xaa   :  { %v391_v45 = vpop.eup %390 }
  0xab   :  { %v328_v46 = vmul.f32 %v391_v45, %v326_v41 }
  0xad   :  { %v329_v22 = vmul.f32 %v391_v45, %v328_v46 }
  0xaf   :  { %v330_v14 = vmul.f32 0.5, %v329_v22  ;;  %v341_v47 = vld [vmem:[#allocation4] sm:$0x3] }
  0xb0   :  { %343 = vst.msk [vmem:[#allocation8 + $0x4] sm:$0x3] %vm48_vm13, %v341_v47 }
  0xb1   :  { %v331_v48 = vsub.f32 1.5, %v330_v14 }
  0xb3   :  { %v332_v60 = vmul.f32 %v391_v45, %v331_v48 }
  0xb5   :  { %v333_v28 = vmul.f32 %v332_v60, %v326_v41 }
  0xb7   :  { %v335_v50 = vsel %vm334_vm7, %v326_v41, %v333_v28 }
  0xb8   :  { %v338_v51 = vsel %vm336_vm8, %v337_v49, %v335_v50 }
  0xb9   :  { %351 = vst.msk [vmem:[#allocation8 + $0xa] sm:$0x3] %vm48_vm13, %v338_v51 }
  0xba   :  { %364 = dma.vmem_to_hbm [thread:$0]  %s357_s12, 192, %s359_s15, [#allocation9], %s423_s16, %s423_s16, %s424_s17  }
  0xbb   :  { %416 = dma.done.wait [#allocation9], 192  }
  0xbc   :  { %417 = vsyncadd [#allocation9], 4294967104 }
  0xbd   :  { %369 = vsyncpa [#allocation9], 1 }

</bundles_post_ra>
